<compile_context>
chip_gen: v7x
topology: tpu7x:2x2x1
jax: 0.10.0
libtpu: 0.0.40
codegen_flags: <defaults>
</compile_context>

<pallas_src>
import math

import jax
import jax.numpy as jnp
from jax.experimental import pallas as pl
from jax.experimental.pallas import tpu as pltpu

ALPHA = 1.0
GAMMA = 2.0           # baked in as an explicit square below
BETA = 0.99
NUM_CLASSES = 37
LN_BETA = math.log(BETA)   # compile-time constant


def _focal_stats_kernel(n_ref, logits_ref, target_ref, stats_ref):
    """One sample tile -> [2, C] per-class stats (row 0: counts, row 1: sum (1-pt)^2*ce).

    n_ref:      (1,) int32 in SMEM (scalar prefetch) -- number of valid samples
    logits_ref: [tile, C]  (any float dtype; cast to f32 in-kernel)
    target_ref: [tile, 1]  int32
    stats_ref:  [2, C]     f32 output block (one per grid step)
    """
    k = pl.program_id(0)
    tn, c = logits_ref.shape

    n_valid = n_ref[0]
    logits = logits_ref[...].astype(jnp.float32)                    # [tn, C]
    target = target_ref[...]                                        # [tn, 1] int32

    # --- tail-tile masking (last grid step may cover rows past N) ---
    row_ids = k * tn + jax.lax.broadcasted_iota(jnp.int32, (tn, 1), 0)
    row_valid = row_ids < n_valid                                    # [tn, 1] bool
    logits = jnp.where(row_valid, logits, 0.0)                       # kill garbage/inf/NaN rows

    class_ids = jax.lax.broadcasted_iota(jnp.int32, (tn, c), 1)
    match = (class_ids == target) & row_valid                        # [tn, C] bool

    # --- per-sample cross entropy (single EUP exp over the tile) ---
    m = jnp.max(logits, axis=-1, keepdims=True)                      # XLU (only lane reduce kept)
    shifted = logits - m
    e = jnp.exp(shifted)                                             # EUP [tn, C]

    # lane reductions on the MXU: x @ ones[C, 1]
    ones_c = jnp.ones((c, 1), jnp.float32)
    s = jnp.dot(e, ones_c,
                precision=jax.lax.Precision.HIGHEST,
                preferred_element_type=jnp.float32)                  # [tn, 1] softmax denom
    tgt_shift = jnp.dot(jnp.where(match, shifted, 0.0), ones_c,
                        precision=jax.lax.Precision.HIGHEST,
                        preferred_element_type=jnp.float32)          # [tn, 1] target_logit - m

    ce = jnp.log(s) - tgt_shift                                      # [tn, 1]
    pt = jnp.exp(-ce)                                                # EUP (no onehot*e gather)
    one_minus_pt = 1.0 - pt
    fu = one_minus_pt * one_minus_pt * ce                            # gamma = 2 -> square
    fu = jnp.where(row_valid, fu, 0.0)

    # --- per-class stats on the MXU: [tn,2]^T @ onehot[tn,C] -> [2,C] ---
    onehot = match.astype(jnp.float32)                               # zero on invalid rows
    lhs = jnp.concatenate([jnp.ones((tn, 1), jnp.float32), fu], axis=1)   # [tn, 2]
    stats = jax.lax.dot_general(
        lhs, onehot, (((0,), (0,)), ((), ())),
        precision=jax.lax.Precision.HIGHEST,
        preferred_element_type=jnp.float32)                          # [2, C]
    stats_ref[...] = stats


def multi_loss_focal_loss(logits, target, *, tile_n=4096):
    """logits: [N, C] float, target: [N] int -> scalar float32."""
    n, c = logits.shape
    target_2d = target.reshape(n, 1).astype(jnp.int32)

    # Pick a sample-tile size: either the full batch (always a legal block) or a
    # multiple of 8 (sublane) so partial last blocks are allowed.
    tile_n = int(tile_n)
    if tile_n >= n:
        tile = n
    else:
        tile = min(max(8, (tile_n // 8) * 8), n)
    num_tiles = -(-n // tile)

    n_arr = jnp.array([n], dtype=jnp.int32)   # scalar prefetch: valid-sample count

    stats = pl.pallas_call(
        _focal_stats_kernel,
        out_shape=jax.ShapeDtypeStruct((num_tiles, 2, c), jnp.float32),
        grid_spec=pltpu.PrefetchScalarGridSpec(
            num_scalar_prefetch=1,
            grid=(num_tiles,),
            in_specs=[
                pl.BlockSpec((tile, c), lambda k, n_s: (k, 0)),
                pl.BlockSpec((tile, 1), lambda k, n_s: (k, 0)),
            ],
            out_specs=pl.BlockSpec((None, 2, c), lambda k, n_s: (k, 0, 0)),
        ),
        compiler_params=pltpu.CompilerParams(
            # grid steps write independent partial-stat blocks -> fully parallel
            # (lets v7x shard the tile axis across its two TensorCores)
            dimension_semantics=("parallel",),
        ),
    )(n_arr, logits, target_2d)

    # --- tiny (37-element) finalize in plain JAX ---
    counts = jnp.sum(stats[:, 0, :], axis=0)           # [C] batch class counts
    s_focal = jnp.sum(stats[:, 1, :], axis=0)          # [C] per-class sum (1-pt)^2 * ce
    w = jnp.exp(counts * (-LN_BETA))                    # 1 / beta**cnt_j
    focal_mean = ALPHA * jnp.sum(w * s_focal) / float(n)
    inv_cw = jnp.exp(counts * (LN_BETA / float(n)))     # beta**(cnt_j / total), total = n
    return focal_mean * jnp.mean(inv_cw)


def _reference(logits, target):
    """Pure-JAX reference of the PyTorch forward (reduction='mean', first call)."""
    logits = logits.astype(jnp.float32)
    logp = jax.nn.log_softmax(logits, axis=-1)
    ce = -jnp.take_along_axis(logp, target[:, None], axis=-1)[:, 0]
    pt = jnp.exp(-ce)
    onehot = jax.nn.one_hot(target, NUM_CLASSES, dtype=jnp.float32)
    counts = onehot.sum(axis=0)
    weights = 1.0 / BETA ** counts[target]
    focal = ALPHA * (1.0 - pt) ** GAMMA * ce * weights
    class_weights = 1.0 / BETA ** (counts / counts.sum())
    return (focal.mean() / class_weights).mean()


if __name__ == "__main__":
    key = jax.random.PRNGKey(0)
    k1, k2 = jax.random.split(key)
    N = 20  # not a multiple of 8 or of the small tile -> exercises tail masking
    logits = jax.random.normal(k1, (N, NUM_CLASSES), dtype=jnp.float32)
    target = jax.random.randint(k2, (N,), 0, NUM_CLASSES, dtype=jnp.int32)

    ref = _reference(logits, target)

    # multi-step grid (tile=8 -> 3 tiles, last one partial) exercises in-kernel masking
    out_multi = jax.block_until_ready(multi_loss_focal_loss(logits, target, tile_n=8))
    # default large-tile path (single block covering the whole batch)
    out_single = jax.block_until_ready(multi_loss_focal_loss(logits, target))

    assert jnp.allclose(out_multi, ref, rtol=1e-4, atol=1e-5), (out_multi, ref)
    assert jnp.allclose(out_single, ref, rtol=1e-4, atol=1e-5), (out_single, ref)

    print("KERNEL_OK")
</pallas_src>

<mosaic_0001>
module attributes {stable_mosaic.version = 11 : i64} {
  func.func @_focal_stats_kernel(%arg0: i32, %arg1: memref<1xi32, #tpu.memory_space<smem>>, %arg2: memref<8x37xf32, #tpu.memory_space<vmem>>, %arg3: memref<8x1xi32, #tpu.memory_space<vmem>>, %arg4: memref<1x2x37xf32, #tpu.memory_space<vmem>>) attributes {dimension_semantics = [#tpu.dimension_semantics<parallel>], iteration_bounds = array<i64: 3>, scalar_prefetch = 1 : i64, scratch_operands = 0 : i64, tpu.core_type = #tpu.core_type<tc>, window_params = [{transform_indices = @transform_0, window_bounds = array<i64: 8, 37>}, {transform_indices = @transform_1, window_bounds = array<i64: 8, 1>}, {transform_indices = @transform_2, window_bounds = array<i64: 1, 2, 37>}]} {
    %c0 = arith.constant 0 : index
    %0 = memref.load %arg1[%c0] : memref<1xi32, #tpu.memory_space<smem>>
    %c0_0 = arith.constant 0 : index
    %c0_1 = arith.constant 0 : index
    %1 = vector.load %arg2[%c0_0, %c0_1] : memref<8x37xf32, #tpu.memory_space<vmem>>, vector<8x37xf32>
    %c0_2 = arith.constant 0 : index
    %c0_3 = arith.constant 0 : index
    %2 = vector.load %arg3[%c0_2, %c0_3] : memref<8x1xi32, #tpu.memory_space<vmem>>, vector<8x1xi32>
    %c8_i32 = arith.constant 8 : i32
    %3 = arith.muli %arg0, %c8_i32 : i32
    %4 = tpu.iota {dimensions = array<i32: 0>} : vector<8x1xi32>
    %5 = vector.broadcast %3 : i32 to vector<8x1xi32>
    %6 = arith.addi %5, %4 : vector<8x1xi32>
    %7 = vector.broadcast %0 : i32 to vector<8x1xi32>
    %8 = arith.cmpi slt, %6, %7 : vector<8x1xi32>
    %cst = arith.constant 0.000000e+00 : f32
    %9 = vector.shape_cast %8 : vector<8x1xi1> to vector<8x1xi1>
    %10 = vector.broadcast %9 : vector<8x1xi1> to vector<8x37xi1>
    %11 = vector.broadcast %cst : f32 to vector<8x37xf32>
    %12 = arith.select %10, %1, %11 : vector<8x37xi1>, vector<8x37xf32>
    %13 = tpu.iota {dimensions = array<i32: 1>} : vector<8x37xi32>
    %14 = vector.broadcast %2 : vector<8x1xi32> to vector<8x37xi32>
    %15 = arith.cmpi eq, %13, %14 : vector<8x37xi32>
    %16 = vector.broadcast %8 : vector<8x1xi1> to vector<8x37xi1>
    %17 = arith.andi %15, %16 : vector<8x37xi1>
    %cst_4 = arith.constant dense<0xFF800000> : vector<8xf32>
    %18 = vector.multi_reduction <maximumf>, %12, %cst_4 [1] : vector<8x37xf32> to vector<8xf32>
    %19 = vector.shape_cast %18 : vector<8xf32> to vector<8x1xf32>
    %20 = vector.broadcast %19 : vector<8x1xf32> to vector<8x37xf32>
    %21 = arith.subf %12, %20 : vector<8x37xf32>
    %22 = math.exp %21 : vector<8x37xf32>
    %cst_5 = arith.constant 1.000000e+00 : f32
    %23 = vector.broadcast %cst_5 : f32 to vector<37x1xf32>
    %cst_6 = arith.constant dense<0.000000e+00> : vector<8x1xf32>
    %24 = tpu.matmul %22, %23, %cst_6 {dimension_numbers = #tpu.dot_dimension_numbers<[1], [0], [0], [1], [0, 0, 1, 1], [], []>, precision = #tpu.contract_precision<fp32>} : vector<8x37xf32>, vector<37x1xf32>, vector<8x1xf32> -> vector<8x1xf32>
    %cst_7 = arith.constant 0.000000e+00 : f32
    %25 = vector.broadcast %cst_7 : f32 to vector<8x37xf32>
    %26 = arith.select %17, %21, %25 : vector<8x37xi1>, vector<8x37xf32>
    %cst_8 = arith.constant dense<0.000000e+00> : vector<8x1xf32>
    %27 = tpu.matmul %26, %23, %cst_8 {dimension_numbers = #tpu.dot_dimension_numbers<[1], [0], [0], [1], [0, 0, 1, 1], [], []>, precision = #tpu.contract_precision<fp32>} : vector<8x37xf32>, vector<37x1xf32>, vector<8x1xf32> -> vector<8x1xf32>
    %28 = math.log %24 : vector<8x1xf32>
    %29 = arith.subf %28, %27 : vector<8x1xf32>
    %cst_9 = arith.constant 0.000000e+00 : f32
    %30 = vector.broadcast %cst_9 : f32 to vector<8x1xf32>
    %31 = arith.subf %30, %29 : vector<8x1xf32>
    %32 = math.exp %31 : vector<8x1xf32>
    %cst_10 = arith.constant 1.000000e+00 : f32
    %33 = vector.broadcast %cst_10 : f32 to vector<8x1xf32>
    %34 = arith.subf %33, %32 : vector<8x1xf32>
    %35 = arith.mulf %34, %34 : vector<8x1xf32>
    %36 = arith.mulf %35, %29 : vector<8x1xf32>
    %cst_11 = arith.constant 0.000000e+00 : f32
    %37 = vector.broadcast %cst_11 : f32 to vector<8x1xf32>
    %38 = arith.select %8, %36, %37 : vector<8x1xi1>, vector<8x1xf32>
    %39 = arith.extui %17 : vector<8x37xi1> to vector<8x37xi32>
    %40 = arith.sitofp %39 : vector<8x37xi32> to vector<8x37xf32>
    %cst_12 = arith.constant 1.000000e+00 : f32
    %41 = vector.broadcast %cst_12 : f32 to vector<8x1xf32>
    %42 = tpu.concatenate %41, %38 in 1 : vector<8x1xf32>, vector<8x1xf32> -> vector<8x2xf32>
    %cst_13 = arith.constant dense<0.000000e+00> : vector<2x37xf32>
    %43 = tpu.matmul %42, %40, %cst_13 {dimension_numbers = #tpu.dot_dimension_numbers<[0], [0], [1], [1], [0, 1, 1, 1], [], []>, precision = #tpu.contract_precision<fp32>} : vector<8x2xf32>, vector<8x37xf32>, vector<2x37xf32> -> vector<2x37xf32>
    %c0_14 = arith.constant 0 : index
    %c0_15 = arith.constant 0 : index
    %c0_16 = arith.constant 0 : index
    %44 = vector.load %arg4[%c0_14, %c0_15, %c0_16] : memref<1x2x37xf32, #tpu.memory_space<vmem>>, vector<1x2x37xf32>
    %45 = vector.shape_cast %44 : vector<1x2x37xf32> to vector<2x37xf32>
    %46 = vector.shape_cast %43 : vector<2x37xf32> to vector<1x2x37xf32>
    tpu.vector_store %arg4[%c0_14, %c0_15, %c0_16], %46 {strides = array<i32>} : memref<1x2x37xf32, #tpu.memory_space<vmem>>, vector<1x2x37xf32>,
    return
  }
  func.func @transform_0(%arg0: i32, %arg1: memref<1xi32, #tpu.memory_space<smem>>) -> (i32, i32) {
    %c0_i32 = arith.constant 0 : i32
    %c0_i32_0 = arith.constant 0 : i32
    return %arg0, %c0_i32 : i32, i32
  }
  func.func @transform_1(%arg0: i32, %arg1: memref<1xi32, #tpu.memory_space<smem>>) -> (i32, i32) {
    %c0_i32 = arith.constant 0 : i32
    %c0_i32_0 = arith.constant 0 : i32
    return %arg0, %c0_i32 : i32, i32
  }
  func.func @transform_2(%arg0: i32, %arg1: memref<1xi32, #tpu.memory_space<smem>>) -> (i32, i32, i32) {
    %c0_i32 = arith.constant 0 : i32
    %c0_i32_0 = arith.constant 0 : i32
    %c0_i32_1 = arith.constant 0 : i32
    return %arg0, %c0_i32, %c0_i32_0 : i32, i32, i32
  }
}

</mosaic_0001>

<bundles_post_ra>
// kernel: tpu_custom_call.1
= control target key start
LH: loop header
LB: loop body
LE: loop exit
PB: predicated region body
PF: predicated region fallthrough
CT: control target
= control target key end

     0   :  { %s2478_s0 = inlined_call_operand.<no memory space> [shape: s32[1], index: 0, kind: input, shape index: {}]   ;;  %s2479_s1 = inlined_call_operand.vmem [shape: f32[20,37], index: 1, kind: input, shape index: {}]   ;;  %s2480_s2 = inlined_call_operand.vmem [shape: s32[20,1], index: 2, kind: input, shape index: {}]   ;;  %s2481_s3 = inlined_call_operand.hbm [shape: f32[3,2,37], index: 3, kind: output, shape index: {}]  }
   0x1   :  { %8 = sst [smem:[#allocation3]] %s2478_s0 }
   0x2   :  { %9 = vsyncpa [#allocation5], 0 }
   0x3   :  { %11 = vsyncpa [#allocation5 + $0x1], 0  ;;  %s2192_s14 = smov 0   ;;  %s2194_s15 = smov 0  }
   0x4   :  { %s2196_s16 = smov 0   ;;  %s2198_s17 = smov 0  }
   0x5 LB: > { %s2213_s0 = sadd.s32 4294967295, %s2159_s17   ;;  %s1675_s18 = sadd.s32 4294967294, %s2159_s17   ;;  %s2159_s17 = sphi %s2198_s17, %s2491_s17   ;;  %s2155_s16 = sphi %s2196_s16, %s2490_s16   ;;  %s2151_s15 = sphi %s2194_s15, %s2489_s15   ;;  %s2147_s14 = sphi %s2192_s14, %s2488_s14  }
   0x6   : > { %s2217_s19 = sadd.s32 1, %s2159_s17   ;;  %s76_s20 = sadd.s32 1, %s2155_s16 }
   0x7   : > { %s73_s21 = ssub.s32 %s2159_s17, %s2217_s19  ;;  %p86_p0 = scmp.ne.s32.totalorder %s2155_s16, %s2151_s15 }
   0x8   : > { %p74_p1 = scmp.eq.s32.totalorder %s73_s21, 0  ;;  %p87_p2 = scmp.eq.s32.totalorder %s2213_s0, 2 }
   0x9   : > { %p92_p3 = scmp.ne.s32.totalorder %s2151_s15, %s2147_s14  ;;  %p93_p4 = scmp.eq.s32.totalorder %s1675_s18, 2 }
   0xa   : > { %s2228_s22 = scalar_select %p74_p1, %s2155_s16, %s76_s20  }
   0xb   : > { %p2230_p5 = por %p87_p2, %p86_p0  ;;  %p2234_p6 = por %p93_p4, %p92_p3 }
   0xc   : > { %p1678_p7 = scmp.ge.s32.totalorder %s2159_s17, 1  ;;  %p125_p8 = scmp.lt.s32.totalorder %s2159_s17, 4 }
   0xe   : > { %p126_p9 = pnand %p1678_p7, %p125_p8 }
   0xf   : > { %p150_p10 = scmp.lt.s32.totalorder (!%p126_p9), %s2213_s0, 2  ;;  %s158_s25 = sld [smem:[#allocation3]] (!%p126_p9)  ;;  %v162_v0 = vlaneseq (!%p126_p9)  ;;  %v2161_v1 = vmov (!%p126_p9), 0   ;;  %vm178_vm0 = vcmask (!%p126_p9), 302080   ;;  %vm188_vm2 = vcmask (!%p126_p9), 1044480  }
  0x10   : > { %129 = sbr.rel (%p126_p9) target bundleno = 1016 (0x3f8), region = 28  ;;  %s1682_s26 = sshll.u32 (!%p126_p9), %s2213_s0, 3  ;;  %2090 = vset.pattern.permute.xlu0 (!%p126_p9), %v2161_v1  ;;  %v190_v10 = vsel (!%p126_p9), %vm188_vm2, 1.0, %v2161_v1  ;;  %v2162_v12 = vmov (!%p126_p9), 0.0|0.0   ;;  %v2163_v15 = vmov (!%p126_p9), 0.0   ;;  %vm2165_vm3 = vmmov (!%p126_p9), 0  }
  0x11   : > { %v163_v2 = vshrl.u32 (!%p126_p9), %v162_v0, 7  ;;  %v164_v3 = vstv (!%p126_p9), %s1682_s26  ;;  %1971 = vmatprep.subr.bf16.mxu0 (!%p126_p9), %v2162_v12  ;;  %1967 = vmatprep.subr.bf16.mxu1 (!%p126_p9), %v2162_v12  ;;  %v2259_v13 = vsub.f32 (!%p126_p9), %v190_v10, %v190_v10  ;;  %v2164_v18 = vmov (!%p126_p9), 1.0|1.0   ;;  %s2167_s8 = smov (!%p126_p9), 1   ;;  %s147_s9 = sand.u32 (!%p126_p9), 1, %s2151_s15  }
  0x12   : > { %1972 = vmatpush3.bf16.msra.mxu0 (!%p126_p9), %v2162_v12  ;;  %1968 = vmatpush3.bf16.msra.mxu1 (!%p126_p9), %v2164_v18  ;;  %v2166_v19 = vmov (!%p126_p9), 1.0   ;;  %v172_v23 = vand.u32 (!%p126_p9), 127, %v162_v0  ;;  %vm1104_vm6 = vcmask (!%p126_p9), 7168   ;;  %vm1138_vm7 = vcmask (!%p126_p9), 64512   ;;  %s1679_s10 = sshll.u32 (!%p126_p9), %s147_s9, 1  ;;  %s1694_s11 = sshll.u32 (!%p126_p9), %s2213_s0, 5 }
  0x13   : > { %v165_v4 = vadd.s32 (!%p126_p9), %v164_v3, %v163_v2  ;;  %1973 = vmatprep.subr.bf16.mxu0 (!%p126_p9), %v2162_v12  ;;  %v2265_v14 = vand.u32 (!%p126_p9), 4294901760, %v2259_v13  ;;  %1804 = vmatprep.mubr.msk.f32.mxu0 (!%p126_p9), %vm2165_vm3, %v2163_v15  ;;  %s149_s12 = scalar_lea.vmem (!%p126_p9), [#allocation4], %s1679_s10  ;;  %vm1588_vm8 = vcmask (!%p126_p9), 295936   ;;  %s2436_s21 = scalar_lea.hbm (!%p126_p9), %s2481_s3, %s1694_s11 }
  0x14   : > { %1969 = vmatprep.subr.bf16.mxu1 (!%p126_p9), %v2162_v12  ;;  %1791 = vmatprep.mubr.msk.f32.mxu1 (!%p126_p9), %vm2165_vm3, %v2163_v15  ;;  %s1604_s13 = sshll.u32 (!%p126_p9), %s149_s12, 4  ;;  %s2438_s13 = int_to_ptr.vmem [resolvable:$true] %s1604_s13 }
  0x15   : > { %v166_v6 = vstv (!%p126_p9), %s158_s25  ;;  %v280_v16 = vsub.f32 (!%p126_p9), %v2259_v13, %v2265_v14  ;;  %s1591_s25 = scalar_lea.sflag (!%p126_p9), [#allocation5], %s147_s9  ;;  %s2097_s26 = scalar_lea.vmem (!%p126_p9), %s2438_s13, 32 }
  0x16   : > { %vm2246_vm1 = vcmp.lt.s32.totalorder (!%p126_p9), %v165_v4, %v166_v6  ;;  %1974 = vmatpush3.bf16.msra.mxu0 (!%p126_p9), %v2162_v12  ;;  %1970 = vmatpush3.bf16.msra.mxu1 (!%p126_p9), %v2164_v18  ;;  %p2098_p11 = scmp.ne.s32.totalorder (!%p126_p9), %s2438_s13, %s2097_s26 }
  0x17   : > { %s151_s27 = scalar_select %p150_p10, %s2213_s0, 2  ;;  %1802 = vmatprep.subr.mxu0 %v2163_v15  ;;  %v2270_v17 = vand.u32 4294901760, %v280_v16  ;;  %1789 = vmatprep.subr.mxu1 %v2163_v15 }
  0x18   : > { %p2099_p12 = pnand %p2098_p11, %p2230_p5  ;;  %s2168_s0 = smov [#allocation4]  }
  0x19   : > { %s1680_s28 = sshll.u32 %s151_s27, 3  ;;  %s2101_s27 = sshll.u32 %s2168_s0, 4  ;;  %s2102_s27 = int_to_ptr.vmem [resolvable:$false] %s2101_s27 }
  0x1a   : > { %s153_s4 = scalar_lea.vmem %s2479_s1, %s1680_s28  ;;  %s157_s7 = scalar_lea.vmem %s2480_s2, %s1680_s28  ;;  %1803 = vmatpush3.msra.mxu0 %v2270_v17  ;;  %1790 = vmatpush3.msk.msra.mxu1 %vm188_vm2, %v2166_v19 }
  0x1b   : > { %v159_v5 = vld [vmem:[%s153_s4] sm:$0xff]  ;;  %1975 = vmatprep.subr.bf16.mxu0 %v2162_v12  ;;  %1991 = vmatprep.subr.bf16.mxu1 %v2162_v12  ;;  %p2100_p13 = pneg %p2099_p12  ;;  %s2103_s28 = scalar_lea.vmem %s2102_s27, 64 }
  0x1c   : > { %v170_v8 = vsel %vm2246_vm1, %v159_v5, 0.0  ;;  %v160_v11 = vld [vmem:[%s157_s7] sm:$0xff]  ;;  %p2104_p0 = scmp.lt.s32.totalorder %s2438_s13, %s2102_s27  ;;  %p2105_p1 = scmp.lt.s32.totalorder %s2103_s28, %s2097_s26 }
  0x1d   : > { %v179_v9 = vsel %vm178_vm0, %v170_v8, -inf }
  0x1e   : > { %180 = vmax.xlane.f32.xlu0 %v179_v9  ;;  %p2106_p2 = por %p2105_p1, %p2104_p0 }
  0x20   : > { %p2107_p3 = pnand %p2106_p2, %p2100_p13 }
  0x34   : > { %174 = vperm.xlu0 %2090, %v160_v11  }
  0xab   : > { %v181_v20 = vpop.xlane.xlu0 %180 }
  0xac   : > { %v182_v21 = vsub.f32 %v170_v8, %v181_v20 }
  0xae   : > { %v183_v22 = vmul.f32 1.442695, %v182_v21 }
  0xb0   : > { %2091 = vpow2.f32 %v183_v22 }
  0xb3   : > { %v175_v24 = vpop.permute.xlu0 %174 }
  0xb4   : > { %vm176_vm4 = vcmp.eq.s32.totalorder %v172_v23, %v175_v24 }
  0xb5   : > { %vm2287_vm5 = vmand %vm176_vm4, %vm2246_vm1 }
  0xb6   : > { %v638_v26 = vsel %vm2287_vm5, %v182_v21, 0.0  ;;  %v1689_v59 = vsel %vm2287_vm5, 1.0, %v2163_v15 }
  0xb7   : > { %v640_v28 = vsel %vm178_vm0, %v638_v26, 0  ;;  %v1220_v60 = vsub.f32 %v1689_v59, %v1689_v59 }
  0xb8   : > { %v2297_v31 = vand.u32 4294901760, %v640_v28 }
  0xb9   : > { %v1221_v0 = vand.u32 4294901760, %v1220_v60 }
  0xba   : > { %v2092_v27 = vpop.eup %2091  ;;  %v2306_v34 = vsub.f32 %v640_v28, %v2297_v31 }
  0xbb   : > { %v186_v29 = vsel %vm178_vm0, %v2092_v27, 0  ;;  %v1222_v3 = vsub.f32 %v1220_v60, %v1221_v0 }
  0xbc   : > { %v2295_v30 = vand.u32 4294901760, %v186_v29  ;;  %v710_v37 = vand.u32 4294901760, %v2306_v34 }
  0xbd   : > { %v1223_v6 = vand.u32 4294901760, %v1222_v3 }
  0xbe   : > { %1805 = vmatmul.mubr.f32.vlgmr.msra.gmra.mrb[0].mxu0 %v2295_v30  ;;  %v259_v32 = vsub.f32 %v186_v29, %v2295_v30  ;;  %v711_v38 = vsub.f32 %v2306_v34, %v710_v37 }
  0xbf   : > { %1976 = vmatpush3.bf16.msra.mxu0 %v2162_v12  ;;  %1817 = vmatprep.mubr.msk.f32.mxu0 %vm2165_vm3, %v2163_v15 }
  0xc0   : > { %1977 = vmatprep.subr.bf16.mxu0 %v2162_v12  ;;  %v260_v33 = vand.u32 4294901760, %v259_v32  ;;  %v712_v39 = vand.u32 4294901760, %v711_v38 }
  0xc2   : > { %v261_v35 = vsub.f32 %v259_v32, %v260_v33 }
  0xc3   : > { %1978 = vmatpush3.bf16.msra.mxu0 %v2162_v12 }
  0xc4   : > { %1815 = vmatprep.subr.mxu0 %v2163_v15  ;;  %v262_v36 = vand.u32 4294901760, %v261_v35 }
  0xc6   : > { %1792 = vmatmul.mubr.f32.vlgmr.msra.gmra.mrb[0].mxu1 %v262_v36 }
  0xc7   : > { %1816 = vmatpush3.msra.mxu0 %v2259_v13  ;;  %1992 = vmatpush3.bf16.msra.mxu1 %v2164_v18 }
  0xc8   : > { %1818 = vmatmul.mubr.f32.vlgmr.msra.gmra.mrb[0].mxu0 %v259_v32  ;;  %1979 = vmatprep.subr.bf16.mxu0 %v2162_v12 }
  0xc9   : > { %1980 = vmatpush3.bf16.msra.mxu0 %v2164_v18  ;;  %1993 = vmatprep.subr.bf16.mxu1 %v2162_v12 }
  0xca   : > { %1981 = vmatprep.subr.bf16.mxu0 %v2162_v12  ;;  %1869 = vmatprep.mubr.msk.f32.mxu1 %vm2165_vm3, %v2163_v15 }
  0xcb   : > { %1994 = vmatpush3.bf16.msra.mxu1 %v2164_v18  ;;  %1830 = vmatprep.mubr.msk.f32.mxu0 %vm2165_vm3, %v2163_v15 }
  0xcc   : > { %1867 = vmatprep.subr.mxu1 %v2163_v15 }
  0xcd   : > { %1982 = vmatpush3.bf16.msra.mxu0 %v2164_v18 }
  0xce   : > { %1828 = vmatprep.subr.mxu0 %v2163_v15 }
  0xcf   : > { %1868 = vmatpush3.msk.msra.mxu1 %vm188_vm2, %v2166_v19 }
  0xd0   : > { %1870 = vmatmul.mubr.f32.vlgmr.msra.gmra.mrb[2].mxu1 %v712_v39  ;;  %1995 = vmatprep.subr.bf16.mxu1 %v2162_v12 }
  0xd1   : > { %1829 = vmatpush3.msk.msra.mxu0 %vm188_vm2, %v2166_v19  ;;  %1996 = vmatpush3.bf16.msra.mxu1 %v2162_v12 }
  0xd2   : > { %1831 = vmatmul.mubr.f32.vlgmr.msra.gmra.mrb[0].mxu0 %v260_v33  ;;  %1983 = vmatprep.subr.bf16.mxu0 %v2162_v12 }
  0xd3   : > { %1984 = vmatpush3.bf16.msra.mxu0 %v2162_v12  ;;  %1997 = vmatprep.subr.bf16.mxu1 %v2162_v12 }
  0xd4   : > { %1985 = vmatprep.subr.bf16.mxu0 %v2162_v12  ;;  %1882 = vmatprep.mubr.msk.f32.mxu1 %vm2165_vm3, %v2163_v15 }
  0xd5   : > { %1998 = vmatpush3.bf16.msra.mxu1 %v2162_v12  ;;  %1843 = vmatprep.mubr.msk.f32.mxu0 %vm2165_vm3, %v2163_v15 }
  0xd6   : > { %1880 = vmatprep.subr.mxu1 %v2163_v15 }
  0xd7   : > { %1986 = vmatpush3.bf16.msra.mxu0 %v2162_v12 }
  0xd8   : > { %1841 = vmatprep.subr.mxu0 %v2163_v15 }
  0xd9   : > { %1881 = vmatpush3.msra.mxu1 %v2270_v17 }
  0xda   : > { %1883 = vmatmul.mubr.f32.vlgmr.msra.gmra.mrb[2].mxu1 %v2297_v31  ;;  %1999 = vmatprep.subr.bf16.mxu1 %v2162_v12 }
  0xdb   : > { %1842 = vmatpush3.msra.mxu0 %v2265_v14  ;;  %2000 = vmatpush3.bf16.msra.mxu1 %v2162_v12 }
  0xdc   : > { %1844 = vmatmul.mubr.f32.vlgmr.msra.gmra.mrb[0].mxu0 %v2295_v30  ;;  %1987 = vmatprep.subr.bf16.mxu0 %v2162_v12 }
  0xdd   : > { %1988 = vmatpush3.bf16.msra.mxu0 %v2164_v18  ;;  %2001 = vmatprep.subr.bf16.mxu1 %v2162_v12 }
  0xde   : > { %1989 = vmatprep.subr.bf16.mxu0 %v2162_v12  ;;  %1895 = vmatprep.mubr.msk.f32.mxu1 %vm2165_vm3, %v2163_v15 }
  0xdf   : > { %2002 = vmatpush3.bf16.msra.mxu1 %v2162_v12  ;;  %1856 = vmatprep.mubr.msk.f32.mxu0 %vm2165_vm3, %v2163_v15 }
  0xe0   : > { %1893 = vmatprep.subr.mxu1 %v2163_v15 }
  0xe1   : > { %1990 = vmatpush3.bf16.msra.mxu0 %v2164_v18 }
  0xe2   : > { %1854 = vmatprep.subr.mxu0 %v2163_v15 }
  0xe3   : > { %1894 = vmatpush3.msra.mxu1 %v2259_v13 }
  0xe4   : > { %1896 = vmatmul.mubr.f32.vlgmr.msra.gmra.mrb[2].mxu1 %v2306_v34  ;;  %2003 = vmatprep.subr.bf16.mxu1 %v2162_v12 }
  0xe5   : > { %1855 = vmatpush3.msk.msra.mxu0 %vm188_vm2, %v2166_v19  ;;  %2004 = vmatpush3.bf16.msra.mxu1 %v2164_v18 }
  0xe6   : > { %1857 = vmatmul.mubr.f32.vlgmr.msra.gmra.mrb[0].mxu0 %v2295_v30  ;;  %1937 = vmatprep.subr.mxu0 %v2163_v15 }
  0xe7   : > { %1938 = vmatpush3.msk.msra.mxu0 %vm2287_vm5, %v2166_v19  ;;  %2005 = vmatprep.subr.bf16.mxu1 %v2162_v12 }
  0xe8   : > { %1908 = vmatprep.mubr.msk.f32.mxu1 %vm2165_vm3, %v2163_v15  ;;  %1939 = vmatprep.mubr.msk.f32.mxu0 %vm2165_vm3, %v2163_v15 }
  0xe9   : > { %2006 = vmatpush3.bf16.msra.mxu1 %v2164_v18  ;;  %1942 = vmatprep.subr.mxu0 %v2163_v15 }
  0xea   : > { %1906 = vmatprep.subr.mxu1 %v2163_v15 }
  0xed   : > { %1907 = vmatpush3.msk.msra.mxu1 %vm188_vm2, %v2166_v19 }
  0xee   : > { %1909 = vmatmul.mubr.f32.vlgmr.msra.gmra.mrb[2].mxu1 %v710_v37  ;;  %2007 = vmatprep.subr.bf16.mxu1 %v2162_v12 }
  0xef   : > { %2008 = vmatpush3.bf16.msra.mxu1 %v2162_v12  ;;  %1921 = vmatprep.mubr.msk.f32.mxu1 %vm2165_vm3, %v2163_v15 }
  0xf0   : > { %2009 = vmatprep.subr.bf16.mxu1 %v2162_v12 }
  0xf3   : > { %2010 = vmatpush3.bf16.msra.mxu1 %v2162_v12 }
  0xf4   : > { %1919 = vmatprep.subr.mxu1 %v2163_v15 }
  0xf7   : > { %1920 = vmatpush3.msra.mxu1 %v2265_v14 }
  0xf8   : > { %1922 = vmatmul.mubr.f32.vlgmr.msra.gmra.mrb[2].mxu1 %v2297_v31  ;;  %2011 = vmatprep.subr.bf16.mxu1 %v2162_v12 }
  0xf9   : > { %2012 = vmatpush3.bf16.msra.mxu1 %v2164_v18  ;;  %1934 = vmatprep.mubr.msk.f32.mxu1 %vm2165_vm3, %v2163_v15 }
  0xfa   : > { %2013 = vmatprep.subr.bf16.mxu1 %v2162_v12 }
  0xfd   : > { %2014 = vmatpush3.bf16.msra.mxu1 %v2164_v18 }
  0xfe   : > { %1932 = vmatprep.subr.mxu1 %v2163_v15 }
 0x101   : > { %1933 = vmatpush3.msk.msra.mxu1 %vm188_vm2, %v2166_v19 }
 0x102   : > { %1935 = vmatmul.mubr.f32.vlgmr.msra.gmra.mrb[2].mxu1 %v2297_v31 }
 0x199   : > { %v264_v40 = vpop.f32.mrb[0].mxu1 }
 0x19a   : > { %v1793_v41 = vpop.f32.mrb[1].mxu1 }
 0x1b9   : > { %v634_v42 = vpop.f32.mrb[0].mxu0 }
 0x1ba   : > { %v2015_v43 = vadd.f32 %v634_v42, %v264_v40  ;;  %v1858_v44 = vpop.f32.mrb[1].mxu0 }
 0x1bc   : > { %2093 = vlog2.f32 %v2015_v43 }
 0x1c6   : > { %v2094_v45 = vpop.eup %2093 }
 0x1c7   : > { %v1089_v46 = vmul.f32 0.6931472, %v2094_v45 }
 0x1d5   : > { %v1084_v47 = vpop.f32.mrb[2].mxu1 }
 0x1d6   : > { %v1090_v48 = vsub.f32 %v1089_v46, %v1084_v47  ;;  %v1936_v49 = vpop.f32.mrb[3].mxu1 }
 0x1d8   : > { %v1091_v50 = vsub.f32 0.0, %v1090_v48 }
 0x1da   : > { %v1092_v51 = vmul.f32 1.442695, %v1091_v50 }
 0x1dc   : > { %2095 = vpow2.f32 %v1092_v51 }
 0x1e6   : > { %v2096_v52 = vpop.eup %2095 }
 0x1e7   : > { %v1094_v53 = vsub.f32 1.0, %v2096_v52 }
 0x1e9   : > { %v1095_v54 = vmul.f32 %v1094_v53, %v1094_v53 }
 0x1eb   : > { %v1096_v55 = vmul.f32 %v1095_v54, %v1090_v48 }
 0x1ed   : > { %v1097_v56 = vsel %vm2246_vm1, %v1096_v55, 0.0 }
 0x1ee   : > { %1101 = vrot.lane.b32.xlu1 %v1097_v56, %s2167_s8 }
 0x260   : > { %v1102_v57 = vpop.permute.xlu1 %1101 }
 0x261   : > { %v1105_v58 = vsel %vm1104_vm6, 1.0, %v1102_v57 }
 0x262   : > { %1106 = vxpose.xlu1.b32.start.end [1/1] (short) (narrow) %v1105_v58, 8 }
 0x2e2   : > { %v1122_v61 = vpop.trf.xlu1 }
 0x2e3   : > { %v1140_v62 = vsel %vm1138_vm7, %v1122_v61, 0 }
 0x2e4   : > { %v1208_v63 = vand.u32 4294901760, %v1140_v62 }
 0x2e6   : > { %v1209_v1 = vsub.f32 %v1140_v62, %v1208_v63 }
 0x2e8   : > { %v1210_v2 = vand.u32 4294901760, %v1209_v1 }
 0x2ea   : > { %v1211_v4 = vsub.f32 %v1209_v1, %v1210_v2 }
 0x2ec   : > { %v1212_v5 = vand.u32 4294901760, %v1211_v4 }
 0x2ee   : > { %1940 = vmatmul.mubr.f32.vlgmr.msra.gmra.mrb[2].mxu0 %v1212_v5 }
 0x2ef   : > { %1943 = vmatpush3.msra.mxu0 %v1223_v6  ;;  %1944 = vmatprep.mubr.msk.f32.mxu0 %vm2165_vm3, %v2163_v15 }
 0x2f0   : > { %1947 = vmatprep.subr.mxu0 %v2163_v15 }
 0x2f6   : > { %1945 = vmatmul.mubr.f32.vlgmr.msra.gmra.mrb[2].mxu0 %v1208_v63 }
 0x2f7   : > { %1948 = vmatpush3.msra.mxu0 %v1220_v60  ;;  %1949 = vmatprep.mubr.msk.f32.mxu0 %vm2165_vm3, %v2163_v15 }
 0x2f8   : > { %1952 = vmatprep.subr.mxu0 %v2163_v15 }
 0x2fe   : > { %1950 = vmatmul.mubr.f32.vlgmr.msra.gmra.mrb[2].mxu0 %v1209_v1 }
 0x2ff   : > { %1953 = vmatpush3.msk.msra.mxu0 %vm2287_vm5, %v2166_v19  ;;  %1954 = vmatprep.mubr.msk.f32.mxu0 %vm2165_vm3, %v2163_v15 }
 0x300   : > { %1957 = vmatprep.subr.mxu0 %v2163_v15 }
 0x306   : > { %1955 = vmatmul.mubr.f32.vlgmr.msra.gmra.mrb[2].mxu0 %v1210_v2 }
 0x307   : > { %1958 = vmatpush3.msra.mxu0 %v1221_v0  ;;  %1959 = vmatprep.mubr.msk.f32.mxu0 %vm2165_vm3, %v2163_v15 }
 0x308   : > { %1962 = vmatprep.subr.mxu0 %v2163_v15 }
 0x30e   : > { %1960 = vmatmul.mubr.f32.vlgmr.msra.gmra.mrb[2].mxu0 %v1208_v63 }
 0x30f   : > { %1963 = vmatpush3.msk.msra.mxu0 %vm2287_vm5, %v2166_v19  ;;  %1964 = vmatprep.mubr.msk.f32.mxu0 %vm2165_vm3, %v2163_v15 }
 0x316   : > { %1965 = vmatmul.mubr.f32.vlgmr.msra.gmra.mrb[2].mxu0 %v1208_v63 }
 0x3e9   : > { %v1584_v7 = vpop.f32.mrb[2].mxu0 }
 0x3ea   : > { %1589 = vst.msk [vmem:[%s149_s12] sm:$0x3] %vm1588_vm8, %v1584_v7  ;;  %v1966_v8 = vpop.f32.mrb[3].mxu0 }
 0x3eb   : > { %2110 = shalt.err (!%p2107_p3)
}
 0x3ec   : > { %s2111_s29 = scalar_lea.hbm %s2436_s21, 32  ;;  %s2115_s5 = scalar_lea.hbm %s2481_s3, 96 }
 0x3ed   : > { %p2112_p4 = scmp.ne.s32.totalorder %s2436_s21, %s2111_s29  ;;  %p2116_p9 = scmp.lt.u32.totalorder %s2436_s21, %s2481_s3 }
 0x3ee   : > { %p2117_p10 = scmp.lt.u32.totalorder %s2115_s5, %s2111_s29  ;;  %p2119_p12 = scmp.lt.u32.totalorder %s2111_s29, %s2436_s21 }
 0x3ef   : > { %p2113_p7 = pnand %p2112_p4, %p2230_p5 }
 0x3f0   : > { %p2118_p11 = por %p2117_p10, %p2116_p9 }
 0x3f1   : > { %p2114_p8 = pneg %p2113_p7 }
 0x3f2   : > { %p2120_p13 = por %p2119_p12, %p2118_p11 }
 0x3f4   : > { %p2121_p0 = pnand %p2120_p13, %p2114_p8 }
 0x3f6   : > { %2124 = shalt.err (!%p2121_p0)
}
 0x3f7   : > { %2044 = dma.vmem_to_hbm [thread:$0]  (%p2230_p5), %s2438_s13, 32, %s2436_s21, %s1591_s25  }
 0x3f8 PF: > { %p2050_p1 = scmp.ge.s32.totalorder %s2159_s17, 2  ;;  %s1616_s8 = sand.u32 1, %s2147_s14  }
 0x3f9   : > { %s1617_s9 = scalar_lea.sflag [#allocation5], %s1616_s8 }
 0x3fa   : > { %p2047_p2 = pnand %p2050_p1, %p2234_p6 }
 0x3fc   : > { %2142 = dma.done.wait (!%p2047_p2), %s1617_s9, 32  }
 0x3fd   : > { %2144 = vsyncadd (!%p2047_p2), %s1617_s9, 4294967264  ;;  %p14_p3 = scmp.ge.s32.totalorder %s2217_s19, 5   ;;  %s2488_s14 = smov %s2151_s15 }
 0x3fe   : > { %s2489_s15 = smov %s2155_s16  ;;  %s2490_s16 = smov %s2228_s22 }
 0x3ff   : > { %s2491_s17 = smov %s2217_s19  ;;  %16 = sbr.rel (!%p14_p3) target bundleno = 5 (0x5), region = 66 }
 0x406   :  { %1622 = vsyncpa [#allocation5], 1 }
 0x407   :  { %1624 = vsyncpa [#allocation5 + $0x1], 1 }

</bundles_post_ra>
